<compile_context>
chip_gen: v7x
topology: tpu7x:2x2x1
jax: 0.10.0
libtpu: 0.0.40
codegen_flags: <defaults>
</compile_context>

<pallas_src>
import functools

import jax
import jax.numpy as jnp
from jax.experimental import pallas as pl
from jax.experimental.pallas import tpu as pltpu


def _round_up(n, m):
    return ((n + m - 1) // m) * m


def baseline_policy_kernel(x_ref, w1_ref, w2_ref, w3_ref, b_ref, o_ref, *, hidden, ad_pad):
    x = x_ref[...]                       # (TB, SD_PAD) bf16
    b1 = b_ref[0:1, :hidden]             # (1, hidden) f32
    b2 = b_ref[1:2, :hidden]
    b3 = b_ref[2:3, :ad_pad]

    # Layer 1: Linear(state_dim -> hidden) + ReLU   (bf16 MXU, f32 accumulate)
    h1 = jnp.dot(x, w1_ref[...], preferred_element_type=jnp.float32) + b1
    h1 = jnp.maximum(h1, 0.0).astype(jnp.bfloat16)
    # Layer 2: Linear(hidden -> hidden) + ReLU
    h2 = jnp.dot(h1, w2_ref[...], preferred_element_type=jnp.float32) + b2
    h2 = jnp.maximum(h2, 0.0).astype(jnp.bfloat16)
    # Layer 3: Linear(hidden -> action_dim_padded) + Tanh
    out = jnp.dot(h2, w3_ref[...], preferred_element_type=jnp.float32) + b3
    o_ref[...] = jnp.tanh(out).astype(o_ref.dtype)


def init_params(key, state_dim=7, action_dim=4, hidden_dim=128):
    """Deterministic init mimicking PyTorch nn.Linear default (U[-1/sqrt(fan_in), +1/sqrt(fan_in)])."""
    ks = jax.random.split(key, 6)

    def linear(kw, kb, fan_in, fan_out):
        bound = 1.0 / jnp.sqrt(fan_in)
        w = jax.random.uniform(kw, (fan_in, fan_out), jnp.float32, -bound, bound)
        b = jax.random.uniform(kb, (1, fan_out), jnp.float32, -bound, bound)
        return w, b

    w1, b1 = linear(ks[0], ks[1], state_dim, hidden_dim)
    w2, b2 = linear(ks[2], ks[3], hidden_dim, hidden_dim)
    w3, b3 = linear(ks[4], ks[5], hidden_dim, action_dim)
    return {"w1": w1, "b1": b1, "w2": w2, "b2": b2, "w3": w3, "b3": b3}


def pack_params(params):
    """One-time repack: pad + cast weights to bf16, pack the three biases into one operand."""
    w1, b1 = params["w1"], params["b1"]
    w2, b2 = params["w2"], params["b2"]
    w3, b3 = params["w3"], params["b3"]
    state_dim, hidden = w1.shape
    action_dim = w3.shape[1]
    sd_pad = _round_up(max(state_dim, 8), 8)      # sublane-align the tiny K of layer 1
    ad_pad = _round_up(action_dim, 128)           # lane-dense output width
    w = max(hidden, ad_pad)

    w1p = jnp.zeros((sd_pad, hidden), jnp.float32).at[:state_dim, :].set(w1)
    w3p = jnp.zeros((hidden, ad_pad), jnp.float32).at[:, :action_dim].set(w3)
    b3p = jnp.zeros((ad_pad,), jnp.float32).at[:action_dim].set(b3[0])
    biases = (jnp.zeros((3, w), jnp.float32)
              .at[0, :hidden].set(b1[0])
              .at[1, :hidden].set(b2[0])
              .at[2, :ad_pad].set(b3p))

    return {
        "w1": w1p.astype(jnp.bfloat16),
        "w2": w2.astype(jnp.bfloat16),
        "w3": w3p.astype(jnp.bfloat16),
        "b": biases,                               # f32, packed rows [b1; b2; b3]
        "action_dim": action_dim,
    }


def baseline_policy_forward(x, packed, *, tb=512):
    """x: (B, state_dim) f32. packed: output of pack_params. Returns (B, action_dim) f32."""
    B, state_dim = x.shape
    w1p, w2, w3p, biases = packed["w1"], packed["w2"], packed["w3"], packed["b"]
    action_dim = packed["action_dim"]
    sd_pad, hidden = w1p.shape
    ad_pad = w3p.shape[1]

    # Batch tile: as large as useful, capped to (padded) batch.
    tb = min(tb, _round_up(max(B, 8), 8))
    b_pad = _round_up(B, tb)

    # Pad batch + state_dim, cast activations to bf16 for the MXU.
    xp = jnp.zeros((b_pad, sd_pad), jnp.bfloat16)
    xp = xp.at[:B, :state_dim].set(x.astype(jnp.bfloat16))

    resident = lambda i: (0, 0)  # weights/biases: same block every grid step -> stay in VMEM
    out = pl.pallas_call(
        functools.partial(baseline_policy_kernel, hidden=hidden, ad_pad=ad_pad),
        out_shape=jax.ShapeDtypeStruct((b_pad, ad_pad), jnp.float32),
        grid=(b_pad // tb,),
        in_specs=[
            pl.BlockSpec((tb, sd_pad), lambda i: (i, 0)),
            pl.BlockSpec(w1p.shape, resident),
            pl.BlockSpec(w2.shape, resident),
            pl.BlockSpec(w3p.shape, resident),
            pl.BlockSpec(biases.shape, resident),
        ],
        out_specs=pl.BlockSpec((tb, ad_pad), lambda i: (i, 0)),
        compiler_params=pltpu.CompilerParams(dimension_semantics=("parallel",)),
    )(xp, w1p, w2, w3p, biases)

    return out[:B, :action_dim]


def reference_forward(x, p):
    h1 = jnp.maximum(x @ p["w1"] + p["b1"], 0.0)
    h2 = jnp.maximum(h1 @ p["w2"] + p["b2"], 0.0)
    return jnp.tanh(h2 @ p["w3"] + p["b3"])


if __name__ == "__main__":
    key = jax.random.PRNGKey(0)
    k_params, k_x = jax.random.split(key)

    batch, state_dim, action_dim, hidden_dim = 8, 7, 4, 128
    params = init_params(k_params, state_dim, action_dim, hidden_dim)
    packed = pack_params(params)
    x = jax.random.normal(k_x, (batch, state_dim), jnp.float32)

    out = baseline_policy_forward(x, packed)
    out = jax.block_until_ready(out)

    ref = reference_forward(x, params)
    assert out.shape == (batch, action_dim)
    # bf16 matmul inputs with f32 accumulation: tolerance relaxed vs the pure-f32 kernel.
    max_err = float(jnp.max(jnp.abs(out - ref)))
    assert max_err < 2.5e-2, f"mismatch vs reference (max abs err {max_err})"

    print("KERNEL_OK")
</pallas_src>

<mosaic_0001>
module attributes {stable_mosaic.version = 11 : i64} {
  func.func @baseline_policy_kernel(%arg0: i32, %arg1: memref<8x8xbf16, #tpu.memory_space<vmem>>, %arg2: memref<8x128xbf16, #tpu.memory_space<vmem>>, %arg3: memref<128x128xbf16, #tpu.memory_space<vmem>>, %arg4: memref<128x128xbf16, #tpu.memory_space<vmem>>, %arg5: memref<3x128xf32, #tpu.memory_space<vmem>>, %arg6: memref<8x128xf32, #tpu.memory_space<vmem>>) attributes {dimension_semantics = [#tpu.dimension_semantics<parallel>], iteration_bounds = array<i64: 1>, scalar_prefetch = 0 : i64, scratch_operands = 0 : i64, tpu.core_type = #tpu.core_type<tc>, window_params = [{transform_indices = @transform_0, window_bounds = array<i64: 8, 8>}, {pipeline_mode = #tpu.pipeline_mode<synchronous>, transform_indices = @transform_1, window_bounds = array<i64: 8, 128>}, {pipeline_mode = #tpu.pipeline_mode<synchronous>, transform_indices = @transform_2, window_bounds = array<i64: 128, 128>}, {pipeline_mode = #tpu.pipeline_mode<synchronous>, transform_indices = @transform_3, window_bounds = array<i64: 128, 128>}, {pipeline_mode = #tpu.pipeline_mode<synchronous>, transform_indices = @transform_4, window_bounds = array<i64: 3, 128>}, {transform_indices = @transform_5, window_bounds = array<i64: 8, 128>}]} {
    %c0 = arith.constant 0 : index
    %c0_0 = arith.constant 0 : index
    %0 = vector.load %arg1[%c0, %c0_0] : memref<8x8xbf16, #tpu.memory_space<vmem>>, vector<8x8xbf16>
    %c0_1 = arith.constant 0 : index
    %c0_2 = arith.constant 0 : index
    %1 = vector.load %arg5[%c0_1, %c0_2] : memref<3x128xf32, #tpu.memory_space<vmem>>, vector<1x128xf32>
    %c1 = arith.constant 1 : index
    %c0_3 = arith.constant 0 : index
    %2 = vector.load %arg5[%c1, %c0_3] : memref<3x128xf32, #tpu.memory_space<vmem>>, vector<1x128xf32>
    %c2 = arith.constant 2 : index
    %c0_4 = arith.constant 0 : index
    %3 = vector.load %arg5[%c2, %c0_4] : memref<3x128xf32, #tpu.memory_space<vmem>>, vector<1x128xf32>
    %c0_5 = arith.constant 0 : index
    %c0_6 = arith.constant 0 : index
    %4 = vector.load %arg2[%c0_5, %c0_6] : memref<8x128xbf16, #tpu.memory_space<vmem>>, vector<8x128xbf16>
    %cst = arith.constant dense<0.000000e+00> : vector<8x128xf32>
    %5 = tpu.matmul %0, %4, %cst {dimension_numbers = #tpu.dot_dimension_numbers<[1], [0], [0], [1], [0, 0, 1, 1], [], []>} : vector<8x8xbf16>, vector<8x128xbf16>, vector<8x128xf32> -> vector<8x128xf32>
    %6 = vector.broadcast %1 : vector<1x128xf32> to vector<8x128xf32>
    %7 = arith.addf %5, %6 : vector<8x128xf32>
    %cst_7 = arith.constant 0.000000e+00 : f32
    %8 = vector.broadcast %cst_7 : f32 to vector<8x128xf32>
    %9 = arith.maximumf %7, %8 : vector<8x128xf32>
    %10 = arith.truncf %9 : vector<8x128xf32> to vector<8x128xbf16>
    %c0_8 = arith.constant 0 : index
    %c0_9 = arith.constant 0 : index
    %11 = vector.load %arg3[%c0_8, %c0_9] : memref<128x128xbf16, #tpu.memory_space<vmem>>, vector<128x128xbf16>
    %cst_10 = arith.constant dense<0.000000e+00> : vector<8x128xf32>
    %12 = tpu.matmul %10, %11, %cst_10 {dimension_numbers = #tpu.dot_dimension_numbers<[1], [0], [0], [1], [0, 0, 1, 1], [], []>} : vector<8x128xbf16>, vector<128x128xbf16>, vector<8x128xf32> -> vector<8x128xf32>
    %13 = vector.broadcast %2 : vector<1x128xf32> to vector<8x128xf32>
    %14 = arith.addf %12, %13 : vector<8x128xf32>
    %cst_11 = arith.constant 0.000000e+00 : f32
    %15 = vector.broadcast %cst_11 : f32 to vector<8x128xf32>
    %16 = arith.maximumf %14, %15 : vector<8x128xf32>
    %17 = arith.truncf %16 : vector<8x128xf32> to vector<8x128xbf16>
    %c0_12 = arith.constant 0 : index
    %c0_13 = arith.constant 0 : index
    %18 = vector.load %arg4[%c0_12, %c0_13] : memref<128x128xbf16, #tpu.memory_space<vmem>>, vector<128x128xbf16>
    %cst_14 = arith.constant dense<0.000000e+00> : vector<8x128xf32>
    %19 = tpu.matmul %17, %18, %cst_14 {dimension_numbers = #tpu.dot_dimension_numbers<[1], [0], [0], [1], [0, 0, 1, 1], [], []>} : vector<8x128xbf16>, vector<128x128xbf16>, vector<8x128xf32> -> vector<8x128xf32>
    %20 = vector.broadcast %3 : vector<1x128xf32> to vector<8x128xf32>
    %21 = arith.addf %19, %20 : vector<8x128xf32>
    %22 = math.tanh %21 : vector<8x128xf32>
    %c0_15 = arith.constant 0 : index
    %c0_16 = arith.constant 0 : index
    %23 = vector.load %arg6[%c0_15, %c0_16] : memref<8x128xf32, #tpu.memory_space<vmem>>, vector<8x128xf32>
    tpu.vector_store %arg6[%c0_15, %c0_16], %22 {strides = array<i32>} : memref<8x128xf32, #tpu.memory_space<vmem>>, vector<8x128xf32>,
    return
  }
  func.func @transform_0(%arg0: i32) -> (i32, i32) {
    %c0_i32 = arith.constant 0 : i32
    %c0_i32_0 = arith.constant 0 : i32
    return %arg0, %c0_i32 : i32, i32
  }
  func.func @transform_1(%arg0: i32) -> (i32, i32) {
    %c0_i32 = arith.constant 0 : i32
    %c0_i32_0 = arith.constant 0 : i32
    %c0_i32_1 = arith.constant 0 : i32
    return %c0_i32, %c0_i32_0 : i32, i32
  }
  func.func @transform_2(%arg0: i32) -> (i32, i32) {
    %c0_i32 = arith.constant 0 : i32
    %c0_i32_0 = arith.constant 0 : i32
    %c0_i32_1 = arith.constant 0 : i32
    return %c0_i32, %c0_i32_0 : i32, i32
  }
  func.func @transform_3(%arg0: i32) -> (i32, i32) {
    %c0_i32 = arith.constant 0 : i32
    %c0_i32_0 = arith.constant 0 : i32
    %c0_i32_1 = arith.constant 0 : i32
    return %c0_i32, %c0_i32_0 : i32, i32
  }
  func.func @transform_4(%arg0: i32) -> (i32, i32) {
    %c0_i32 = arith.constant 0 : i32
    %c0_i32_0 = arith.constant 0 : i32
    %c0_i32_1 = arith.constant 0 : i32
    return %c0_i32, %c0_i32_0 : i32, i32
  }
  func.func @transform_5(%arg0: i32) -> (i32, i32) {
    %c0_i32 = arith.constant 0 : i32
    %c0_i32_0 = arith.constant 0 : i32
    return %arg0, %c0_i32 : i32, i32
  }
}

</mosaic_0001>

<bundles_post_ra>
// kernel: tpu_custom_call.1
= control target key start
LH: loop header
LB: loop body
LE: loop exit
PB: predicated region body
PF: predicated region fallthrough
CT: control target
= control target key end

     0   :  { %10 = vsyncpa [#allocation3], 0  ;;  %s731_s0 = inlined_call_operand.hbm [shape: bf16[8,8], index: 0, kind: input, shape index: {}]   ;;  %s732_s1 = inlined_call_operand.hbm [shape: bf16[8,128], index: 1, kind: input, shape index: {}]   ;;  %s733_s2 = inlined_call_operand.hbm [shape: bf16[128,128], index: 2, kind: input, shape index: {}]   ;;  %s734_s3 = inlined_call_operand.hbm [shape: bf16[128,128], index: 3, kind: input, shape index: {}]   ;;  %s735_s4 = inlined_call_operand.vmem [shape: f32[3,128], index: 4, kind: input, shape index: {}]   ;;  %s736_s5 = inlined_call_operand.hbm [shape: f32[8,128], index: 5, kind: output, shape index: {}]  }
   0x1   :  { %11 = vsyncpa [#allocation6], 0 }
   0x2   :  { %12 = vsyncpa [#allocation9], 0 }
   0x3   :  { %13 = vsyncpa [#allocation4], 0  ;;  %s600_s18 = smov [#allocation5]   ;;  %s601_s20 = smov [#allocation2]  }
   0x4   :  { %s30_s19 = sshll.u32 %s600_s18, 4  ;;  %s20_s21 = sshll.u32 %s601_s20, 4  ;;  %s31_s19 = int_to_ptr.vmem [resolvable:$true] %s30_s19  ;;  %s21_s21 = int_to_ptr.vmem [resolvable:$true] %s20_s21 }
   0x5   :  { %s482_s24 = scalar_lea.hbm %s732_s1, 64 }
   0x6   :  { %p483_p0 = scmp.ne.s32.totalorder %s732_s1, %s482_s24  ;;  %p486_p1 = scmp.lt.u32.totalorder %s482_s24, %s732_s1 }
   0x8   :  { %p488_p2 = pnand %p486_p1, %p483_p0 }
   0xa   :  { %491 = shalt.err (!%p488_p2)
}
   0xb   :  { %s492_s29 = scalar_lea.vmem %s31_s19, 64  ;;  %p497_p4 = scmp.lt.s32.totalorder %s31_s19, %s31_s19 }
   0xc   :  { %p493_p3 = scmp.ne.s32.totalorder %s31_s19, %s492_s29  ;;  %p498_p5 = scmp.lt.s32.totalorder %s492_s29, %s492_s29 }
   0xe   :  { %p499_p6 = por %p498_p5, %p497_p4 }
  0x10   :  { %p500_p7 = pnand %p499_p6, %p493_p3 }
  0x12   :  { %503 = shalt.err (!%p500_p7)
}
  0x13   :  { %33 = dma.hbm_to_vmem [thread:$0]  %s732_s1, 64, %s31_s19, [#allocation6]  }
  0x14   :  { %s504_s9 = scalar_lea.hbm %s731_s0, 64 }
  0x15   :  { %p505_p8 = scmp.ne.s32.totalorder %s731_s0, %s504_s9  ;;  %p508_p9 = scmp.lt.u32.totalorder %s504_s9, %s731_s0 }
  0x17   :  { %p510_p10 = pnand %p508_p9, %p505_p8 }
  0x19   :  { %513 = shalt.err (!%p510_p10)
}
  0x1a   :  { %s514_s14 = scalar_lea.vmem %s21_s21, 64  ;;  %p519_p12 = scmp.lt.s32.totalorder %s21_s21, %s21_s21 }
  0x1b   :  { %p515_p11 = scmp.ne.s32.totalorder %s21_s21, %s514_s14  ;;  %p520_p13 = scmp.lt.s32.totalorder %s514_s14, %s514_s14 }
  0x1d   :  { %p521_p0 = por %p520_p13, %p519_p12 }
  0x1f   :  { %p522_p1 = pnand %p521_p0, %p515_p11 }
  0x21   :  { %525 = shalt.err (!%p522_p1)
}
  0x22   :  { %23 = dma.hbm_to_vmem [thread:$0]  %s731_s0, 64, %s21_s21, [#allocation3]  }
  0x23   :  { %s602_s16 = smov [#allocation7]   ;;  %s526_s20 = scalar_lea.hbm %s733_s2, 1024 }
  0x24   :  { %s39_s17 = sshll.u32 %s602_s16, 4  ;;  %p527_p2 = scmp.ne.s32.totalorder %s733_s2, %s526_s20  ;;  %s40_s17 = int_to_ptr.vmem [resolvable:$true] %s39_s17 }
  0x25   :  { %p530_p3 = scmp.lt.u32.totalorder %s526_s20, %s733_s2 }
  0x27   :  { %p532_p4 = pnand %p530_p3, %p527_p2 }
  0x29   :  { %535 = shalt.err (!%p532_p4)
}
  0x2a   :  { %s536_s26 = scalar_lea.vmem %s40_s17, 1024  ;;  %p541_p6 = scmp.lt.s32.totalorder %s40_s17, %s40_s17 }
  0x2b   :  { %p537_p5 = scmp.ne.s32.totalorder %s40_s17, %s536_s26  ;;  %p542_p7 = scmp.lt.s32.totalorder %s536_s26, %s536_s26 }
  0x2d   :  { %p543_p8 = por %p542_p7, %p541_p6 }
  0x2f   :  { %p544_p9 = pnand %p543_p8, %p537_p5 }
  0x31   :  { %547 = shalt.err (!%p544_p9)
}
  0x32   :  { %s603_s0 = smov 64   ;;  %s604_s21 = smov 4  }
  0x33   :  { %45 = dma.hbm_to_vmem [thread:$0]  %s733_s2, 1024, %s40_s17, [#allocation6], %s603_s0, %s603_s0, %s604_s21  }
  0x34   :  { %s605_s29 = smov [#allocation8]   ;;  %s548_s8 = scalar_lea.hbm %s734_s3, 1024 }
  0x35   :  { %s51_s30 = sshll.u32 %s605_s29, 4  ;;  %p549_p10 = scmp.ne.s32.totalorder %s734_s3, %s548_s8  ;;  %s52_s30 = int_to_ptr.vmem [resolvable:$true] %s51_s30 }
  0x36   :  { %p552_p11 = scmp.lt.u32.totalorder %s548_s8, %s734_s3 }
  0x38   :  { %p554_p12 = pnand %p552_p11, %p549_p10 }
  0x3a   :  { %557 = shalt.err (!%p554_p12)
}
  0x3b   :  { %s558_s13 = scalar_lea.vmem %s52_s30, 1024  ;;  %p563_p0 = scmp.lt.s32.totalorder %s52_s30, %s52_s30 }
  0x3c   :  { %p559_p13 = scmp.ne.s32.totalorder %s52_s30, %s558_s13  ;;  %p564_p1 = scmp.lt.s32.totalorder %s558_s13, %s558_s13 }
  0x3e   :  { %p565_p2 = por %p564_p1, %p563_p0 }
  0x40   :  { %p566_p3 = pnand %p565_p2, %p559_p13 }
  0x42   :  { %569 = shalt.err (!%p566_p3)
}
  0x43   :  { %57 = dma.hbm_to_vmem [thread:$0]  %s734_s3, 1024, %s52_s30, [#allocation9], %s603_s0, %s603_s0, %s604_s21  }
  0x44   :  { %592 = dma.done.wait [#allocation3], 64  }
  0x45   :  { %593 = vsyncadd [#allocation3], 4294967232 }
  0x46   :  { %594 = dma.done.wait [#allocation6], 1088  }
  0x47   :  { %595 = vsyncadd [#allocation6], 4294966208 }
  0x48   :  { %596 = dma.done.wait [#allocation9], 1024  }
  0x49   :  { %597 = vsyncadd [#allocation9], 4294966272  ;;  %v606_v0 = vmov 0.0   ;;  %vm607_vm0 = vmmov 0   ;;  %vm86_vm1 = vcmask 1043456   ;;  %vm82_vm2 = vcmask 64512  }
  0x4a   :  { %409 = vmatprep.subr.bf16.mxu0 %v606_v0  ;;  %411 = vmatprep.mubr.msk.bf16.mxu0 %vm607_vm0, %v606_v0  ;;  %v77_v1 = vld [vmem:[#allocation5] sm:$0xf]  ;;  %v464_v3 = vld [vmem:[#allocation7] sm:$0xff]   ;;  %v73_v4 = vld [vmem:[#allocation2] sm:$0xf]  ;;  %s608_s19 = smov [#allocation10]  }
  0x4b   :  { %415 = vmatprep.subr.bf16.mxu1 %v606_v0  ;;  %431 = vmatprep.mubr.msk.bf16.mxu1 %vm607_vm0, %v606_v0  ;;  %v88_v2 = vsel %vm86_vm1, %v77_v1, 0  ;;  %v465_v5 = vld [vmem:[#allocation7 + $0x8] sm:$0xff]   ;;  %v466_v6 = vld [vmem:[#allocation7 + $0x10] sm:$0xff]   ;;  %v467_v7 = vld [vmem:[#allocation7 + $0x18] sm:$0xff]   ;;  %s358_s20 = sshll.u32 %s608_s19, 4  ;;  %s359_s20 = int_to_ptr.vmem [resolvable:$true] %s358_s20 }
  0x4c   :  { %410 = vmatpush3.bf16.msra.mxu0 %v88_v2  ;;  %416 = vmatpush3.bf16.msra.mxu1 %v464_v3  ;;  %v468_v8 = vld [vmem:[#allocation7 + $0x20] sm:$0xff]   ;;  %v469_v9 = vld [vmem:[#allocation7 + $0x28] sm:$0xff]   ;;  %v470_v10 = vld [vmem:[#allocation7 + $0x30] sm:$0xff]   ;;  %s570_s22 = scalar_lea.vmem %s359_s20, 128  ;;  %p575_p5 = scmp.lt.s32.totalorder %s359_s20, %s359_s20 }
  0x4d   :  { %435 = vmatprep.subr.bf16.mxu0 %v606_v0  ;;  %417 = vmatprep.subr.bf16.mxu1 %v606_v0  ;;  %v471_v11 = vld [vmem:[#allocation7 + $0x38] sm:$0xff]   ;;  %v472_v12 = vld [vmem:[#allocation8] sm:$0xff]   ;;  %v473_v13 = vld [vmem:[#allocation8 + $0x8] sm:$0xff]   ;;  %p571_p4 = scmp.ne.s32.totalorder %s359_s20, %s570_s22  ;;  %p576_p6 = scmp.lt.s32.totalorder %s570_s22, %s570_s22 }
  0x4e   :  { %v474_v14 = vld [vmem:[#allocation8 + $0x10] sm:$0xff]   ;;  %v475_v15 = vld [vmem:[#allocation8 + $0x18] sm:$0xff]   ;;  %v476_v16 = vld [vmem:[#allocation8 + $0x20] sm:$0xff]  }
  0x4f   :  { %412 = vmatmul.mubr.msk.bf16.vlgmr.msra.gmra.mrb[0].mxu0 %vm82_vm2, %v73_v4  ;;  %v477_v17 = vld [vmem:[#allocation8 + $0x28] sm:$0xff]   ;;  %v369_v18 = vld [vmem:[%s735_s4] ss:$0 sm:$0xff]  ;;  %v478_v26 = vld [vmem:[#allocation8 + $0x30] sm:$0xff]   ;;  %p577_p7 = por %p576_p6, %p575_p5 }
  0x50   :  { %451 = vmatprep.mubr.msk.bf16.mxu0 %vm607_vm0, %v606_v0  ;;  %418 = vmatpush3.bf16.msra.mxu1 %v465_v5  ;;  %v479_v27 = vld [vmem:[#allocation8 + $0x38] sm:$0xff]  }
  0x51   :  { %419 = vmatprep.subr.bf16.mxu1 %v606_v0  ;;  %436 = vmatpush3.bf16.msra.mxu0 %v472_v12  ;;  %v371_v28 = vld [vmem:[%s735_s4 + $0x1] ss:$0 sm:$0xff]  ;;  %v380_v36 = vld [vmem:[%s735_s4 + $0x2] ss:$0 sm:$0xff]  ;;  %p578_p8 = pnand %p577_p7, %p571_p4 }
  0x52   :  { %437 = vmatprep.subr.bf16.mxu0 %v606_v0 }
  0x54   :  { %420 = vmatpush3.bf16.msra.mxu1 %v466_v6 }
  0x55   :  { %421 = vmatprep.subr.bf16.mxu1 %v606_v0  ;;  %438 = vmatpush3.bf16.msra.mxu0 %v473_v13 }
  0x56   :  { %439 = vmatprep.subr.bf16.mxu0 %v606_v0 }
  0x58   :  { %422 = vmatpush3.bf16.msra.mxu1 %v467_v7 }
  0x59   :  { %423 = vmatprep.subr.bf16.mxu1 %v606_v0  ;;  %440 = vmatpush3.bf16.msra.mxu0 %v474_v14 }
  0x5a   :  { %441 = vmatprep.subr.bf16.mxu0 %v606_v0 }
  0x5c   :  { %424 = vmatpush3.bf16.msra.mxu1 %v468_v8 }
  0x5d   :  { %425 = vmatprep.subr.bf16.mxu1 %v606_v0  ;;  %442 = vmatpush3.bf16.msra.mxu0 %v475_v15 }
  0x5e   :  { %443 = vmatprep.subr.bf16.mxu0 %v606_v0 }
  0x60   :  { %426 = vmatpush3.bf16.msra.mxu1 %v469_v9 }
  0x61   :  { %427 = vmatprep.subr.bf16.mxu1 %v606_v0  ;;  %444 = vmatpush3.bf16.msra.mxu0 %v476_v16 }
  0x62   :  { %445 = vmatprep.subr.bf16.mxu0 %v606_v0 }
  0x64   :  { %428 = vmatpush3.bf16.msra.mxu1 %v470_v10 }
  0x65   :  { %429 = vmatprep.subr.bf16.mxu1 %v606_v0  ;;  %446 = vmatpush3.bf16.msra.mxu0 %v477_v17 }
  0x66   :  { %447 = vmatprep.subr.bf16.mxu0 %v606_v0 }
  0x68   :  { %430 = vmatpush3.bf16.msra.mxu1 %v471_v11 }
  0x69   :  { %448 = vmatpush3.bf16.msra.mxu0 %v478_v26 }
  0x6a   :  { %449 = vmatprep.subr.bf16.mxu0 %v606_v0 }
  0x6d   :  { %450 = vmatpush3.bf16.msra.mxu0 %v479_v27 }
 0x122   :  { %v124_v19 = vpop.f32.mrb[0].mxu0 }
 0x123   :  { %v125_v20 = vadd.f32 %v369_v18, %v124_v19  ;;  %v413_v21 = vpop.f32.mrb[1].mxu0 }
 0x124   :  { %v127_v22 = vpop.f32.mrb[2].mxu0 }
 0x125   :  { %v130_v23 = vmax.f32 %v125_v20, 0.0  ;;  %v414_v24 = vpop.f32.mrb[3].mxu0 }
 0x127   :  { %v131_v25 = vpack.c.bf16 %v130_v23, %v130_v23 }
 0x129   :  { %432 = vmatmul.mubr.bf16.vlgmr.msra.gmra.mrb[0].mxu1 %v131_v25 }
 0x1fc   :  { %v234_v29 = vpop.f32.mrb[0].mxu1 }
 0x1fd   :  { %v235_v30 = vadd.f32 %v371_v28, %v234_v29  ;;  %v433_v31 = vpop.f32.mrb[1].mxu1 }
 0x1fe   :  { %v237_v32 = vpop.f32.mrb[2].mxu1 }
 0x1ff   :  { %v240_v33 = vmax.f32 %v235_v30, 0.0  ;;  %v434_v34 = vpop.f32.mrb[3].mxu1 }
 0x201   :  { %v241_v35 = vpack.c.bf16 %v240_v33, %v240_v33 }
 0x203   :  { %452 = vmatmul.mubr.bf16.vlgmr.msra.gmra.mrb[4].mxu0 %v241_v35 }
 0x2d6   :  { %v344_v37 = vpop.f32.mrb[4].mxu0 }
 0x2d7   :  { %v345_v38 = vadd.f32 %v380_v36, %v344_v37  ;;  %v453_v39 = vpop.f32.mrb[5].mxu0 }
 0x2d8   :  { %v347_v40 = vpop.f32.mrb[6].mxu0 }
 0x2d9   :  { %480 = vtanh.f32 %v345_v38  ;;  %v454_v41 = vpop.f32.mrb[7].mxu0 }
 0x2e3   :  { %v481_v42 = vpop.eup %480 }
 0x2e4   :  { %351 = vst [vmem:[#allocation10] sm:$0xff] %v481_v42 }
 0x2e5   :  { %581 = shalt.err (!%p578_p8)
}
 0x2e6   :  { %s582_s24 = scalar_lea.hbm %s736_s5, 128 }
 0x2e7   :  { %p583_p9 = scmp.ne.s32.totalorder %s736_s5, %s582_s24  ;;  %p586_p10 = scmp.lt.u32.totalorder %s582_s24, %s736_s5 }
 0x2e9   :  { %p588_p11 = pnand %p586_p10, %p583_p9 }
 0x2eb   :  { %591 = shalt.err (!%p588_p11)
}
 0x2ec   :  { %361 = dma.vmem_to_hbm [thread:$0]  %s359_s20, 128, %s736_s5, [#allocation4]  }
 0x2ed   :  { %598 = dma.done.wait [#allocation4], 128  }
 0x2ee   :  { %599 = vsyncadd [#allocation4], 4294967168 }
 0x2ef   :  { %365 = vsyncpa [#allocation3], 1 }
 0x2f0   :  { %366 = vsyncpa [#allocation6], 1 }
 0x2f1   :  { %367 = vsyncpa [#allocation9], 1 }
 0x2f2   :  { %368 = vsyncpa [#allocation4], 1 }

</bundles_post_ra>
